<compile_context>
chip_gen: v5e
topology: v5e:2x2
jax: 0.10.0
libtpu: 0.0.40
codegen_flags: <defaults>
</compile_context>

<pallas_src>
import functools

import jax
import jax.numpy as jnp
from jax import lax
from jax.experimental import pallas as pl
from jax.experimental.pallas import tpu as pltpu


def dwconv_kernel(x_ref, w_ref, b_ref, o_ref, *, img_w, kh_size, kw_size):
    # x_ref: (rows, H*W)   rows = NB*C image-channel rows, spatial on lanes.
    # w_ref: (rows, KH*KW) per-row (per-channel) taps.
    # b_ref: (rows, 1)     per-row bias.
    # o_ref: (rows, H*W)   full-slab output; wrapper crops the valid window.
    rows, hw = x_ref.shape

    x = x_ref[...]          # single lane-dense load of the input slab
    w = w_ref[...]          # single load of all 25 taps

    # Bias folded into the f32 accumulator init (no trailing add pass).
    acc = jnp.broadcast_to(b_ref[...], (rows, hw))

    # Unrolled taps: pltpu.roll follows np.roll semantics
    # (roll(x, s)[i] == x[(i - s) % n]), so shift = hw - delta brings
    # x[i + delta] to lane i.
    for kh in range(kh_size):
        for kw in range(kw_size):
            delta = kh * img_w + kw                       # flattened tap offset
            shifted = x if delta == 0 else pltpu.roll(x, hw - delta, 1)
            t = kh * kw_size + kw
            tap = w[:, t:t + 1]                           # (rows, 1) per-channel weight
            acc = acc + shifted * tap

    o_ref[...] = acc.astype(o_ref.dtype)


def depthwise_conv2d(x, w, b, *, images_per_step=8):
    """Depthwise (groups == channels) valid conv2d, stride 1.

    x: (N, C, H, W), w: (C, KH, KW), b: (C,) -> (N, C, H-KH+1, W-KW+1)
    """
    N, C, H, W = x.shape
    Cw, KH, KW = w.shape
    assert Cw == C, (Cw, C)
    Hout, Wout = H - KH + 1, W - KW + 1
    HW = H * W

    # Pack NB images per grid step along the sublane (row) axis to amortize
    # per-grid-step overhead.  NB*C must either equal the full row count or be
    # a multiple of 8 (sublane rule), so use NB = 8 when tiling the batch.
    if N <= images_per_step:
        NB, Npad = N, N
    else:
        NB = 8
        Npad = pl.cdiv(N, NB) * NB

    x2 = x.reshape(N * C, HW)
    if Npad != N:
        x2 = jnp.pad(x2, ((0, (Npad - N) * C), (0, 0)))
    w2 = jnp.tile(w.reshape(C, KH * KW), (NB, 1))        # (NB*C, KH*KW)
    b2 = jnp.tile(b.reshape(C, 1), (NB, 1))              # (NB*C, 1)

    rows = NB * C
    kernel = functools.partial(
        dwconv_kernel, img_w=W, kh_size=KH, kw_size=KW
    )

    out2 = pl.pallas_call(
        kernel,
        out_shape=jax.ShapeDtypeStruct((Npad * C, HW), x.dtype),
        grid=(Npad // NB,),
        in_specs=[
            pl.BlockSpec((rows, HW), lambda n: (n, 0)),
            pl.BlockSpec((rows, KH * KW), lambda n: (0, 0)),
            pl.BlockSpec((rows, 1), lambda n: (0, 0)),
        ],
        out_specs=pl.BlockSpec((rows, HW), lambda n: (n, 0)),
        compiler_params=pltpu.CompilerParams(
            dimension_semantics=("parallel",)
        ),
    )(x2, w2, b2)

    # Crop the valid output window (all roll contamination lies outside it).
    out = out2.reshape(Npad, C, H, W)[:N, :, :Hout, :Wout]
    return out


class DepthwiseConvDev1:
    """JAX/Pallas port of the PyTorch DepthwiseConvDev1 module."""

    def __init__(self):
        ci_per_group = 1
        co_per_group = 1
        self.group = 7
        self.kernel = 5
        # weight: (C_out, C_in/groups, KH, KW) = (7, 1, 5, 5), arange init.
        numel = co_per_group * self.group * ci_per_group * self.kernel * self.kernel
        w = jnp.arange(numel, dtype=jnp.float32).reshape(
            co_per_group * self.group, ci_per_group, self.kernel, self.kernel
        )
        self.weight = w[:, 0, :, :]                       # (7, 5, 5) depthwise
        self.bias = jnp.zeros((co_per_group * self.group,), jnp.float32)

    def forward(self, x):
        # Matches PyTorch: forward receives a list/tuple and convolves x[0].
        return depthwise_conv2d(x[0], self.weight, self.bias)


def _reference(x, w, b):
    # XLA reference for verification: grouped conv, feature_group_count = C.
    C = w.shape[0]
    out = lax.conv_general_dilated(
        x, w[:, None, :, :],
        window_strides=(1, 1), padding="VALID",
        dimension_numbers=("NCHW", "OIHW", "NCHW"),
        feature_group_count=C,
        precision=lax.Precision.HIGHEST,
    )
    return out + b.reshape(1, C, 1, 1)


if __name__ == "__main__":
    key = jax.random.PRNGKey(0)
    # Small shape consistent with the module: channels = group = 7.
    x0 = jax.random.normal(key, (2, 7, 16, 16), dtype=jnp.float32)
    inputs = [x0]

    mod = DepthwiseConvDev1()
    out = mod.forward(inputs)
    out = jax.block_until_ready(out)

    ref = _reference(x0, mod.weight, mod.bias)
    assert out.shape == ref.shape, (out.shape, ref.shape)
    assert jnp.allclose(out, ref, rtol=1e-4, atol=1e-3), "mismatch vs XLA reference"

    print("KERNEL_OK")
</pallas_src>

<mosaic_0001>
module attributes {stable_mosaic.version = 11 : i64} {
  func.func @dwconv_kernel(%arg0: i32, %arg1: memref<14x256xf32, #tpu.memory_space<vmem>>, %arg2: memref<14x25xf32, #tpu.memory_space<vmem>>, %arg3: memref<14x1xf32, #tpu.memory_space<vmem>>, %arg4: memref<14x256xf32, #tpu.memory_space<vmem>>) attributes {dimension_semantics = [#tpu.dimension_semantics<parallel>], iteration_bounds = array<i64: 1>, scalar_prefetch = 0 : i64, scratch_operands = 0 : i64, tpu.core_type = #tpu.core_type<tc>, window_params = [{transform_indices = @transform_0, window_bounds = array<i64: 14, 256>}, {pipeline_mode = #tpu.pipeline_mode<synchronous>, transform_indices = @transform_1, window_bounds = array<i64: 14, 25>}, {pipeline_mode = #tpu.pipeline_mode<synchronous>, transform_indices = @transform_2, window_bounds = array<i64: 14, 1>}, {transform_indices = @transform_3, window_bounds = array<i64: 14, 256>}]} {
    %c0 = arith.constant 0 : index
    %c0_0 = arith.constant 0 : index
    %0 = vector.load %arg1[%c0, %c0_0] : memref<14x256xf32, #tpu.memory_space<vmem>>, vector<14x256xf32>
    %c0_1 = arith.constant 0 : index
    %c0_2 = arith.constant 0 : index
    %1 = vector.load %arg2[%c0_1, %c0_2] : memref<14x25xf32, #tpu.memory_space<vmem>>, vector<14x25xf32>
    %c0_3 = arith.constant 0 : index
    %c0_4 = arith.constant 0 : index
    %2 = vector.load %arg3[%c0_3, %c0_4] : memref<14x1xf32, #tpu.memory_space<vmem>>, vector<14x1xf32>
    %3 = vector.shape_cast %2 : vector<14x1xf32> to vector<14x1xf32>
    %4 = vector.broadcast %3 : vector<14x1xf32> to vector<14x256xf32>
    %5 = vector.extract_strided_slice %1 {offsets = [0, 0], sizes = [14, 1], strides = [1, 1]} : vector<14x25xf32> to vector<14x1xf32>
    %6 = vector.broadcast %5 : vector<14x1xf32> to vector<14x256xf32>
    %7 = arith.mulf %0, %6 : vector<14x256xf32>
    %8 = arith.addf %4, %7 : vector<14x256xf32>
    %c255_i32 = arith.constant 255 : i32
    %9 = tpu.dynamic_rotate %0 by %c255_i32 dim 1 : vector<14x256xf32>, i32 -> vector<14x256xf32>
    %10 = vector.extract_strided_slice %1 {offsets = [0, 1], sizes = [14, 1], strides = [1, 1]} : vector<14x25xf32> to vector<14x1xf32>
    %11 = vector.broadcast %10 : vector<14x1xf32> to vector<14x256xf32>
    %12 = arith.mulf %9, %11 : vector<14x256xf32>
    %13 = arith.addf %8, %12 : vector<14x256xf32>
    %c254_i32 = arith.constant 254 : i32
    %14 = tpu.dynamic_rotate %0 by %c254_i32 dim 1 : vector<14x256xf32>, i32 -> vector<14x256xf32>
    %15 = vector.extract_strided_slice %1 {offsets = [0, 2], sizes = [14, 1], strides = [1, 1]} : vector<14x25xf32> to vector<14x1xf32>
    %16 = vector.broadcast %15 : vector<14x1xf32> to vector<14x256xf32>
    %17 = arith.mulf %14, %16 : vector<14x256xf32>
    %18 = arith.addf %13, %17 : vector<14x256xf32>
    %c253_i32 = arith.constant 253 : i32
    %19 = tpu.dynamic_rotate %0 by %c253_i32 dim 1 : vector<14x256xf32>, i32 -> vector<14x256xf32>
    %20 = vector.extract_strided_slice %1 {offsets = [0, 3], sizes = [14, 1], strides = [1, 1]} : vector<14x25xf32> to vector<14x1xf32>
    %21 = vector.broadcast %20 : vector<14x1xf32> to vector<14x256xf32>
    %22 = arith.mulf %19, %21 : vector<14x256xf32>
    %23 = arith.addf %18, %22 : vector<14x256xf32>
    %c252_i32 = arith.constant 252 : i32
    %24 = tpu.dynamic_rotate %0 by %c252_i32 dim 1 : vector<14x256xf32>, i32 -> vector<14x256xf32>
    %25 = vector.extract_strided_slice %1 {offsets = [0, 4], sizes = [14, 1], strides = [1, 1]} : vector<14x25xf32> to vector<14x1xf32>
    %26 = vector.broadcast %25 : vector<14x1xf32> to vector<14x256xf32>
    %27 = arith.mulf %24, %26 : vector<14x256xf32>
    %28 = arith.addf %23, %27 : vector<14x256xf32>
    %c240_i32 = arith.constant 240 : i32
    %29 = tpu.dynamic_rotate %0 by %c240_i32 dim 1 : vector<14x256xf32>, i32 -> vector<14x256xf32>
    %30 = vector.extract_strided_slice %1 {offsets = [0, 5], sizes = [14, 1], strides = [1, 1]} : vector<14x25xf32> to vector<14x1xf32>
    %31 = vector.broadcast %30 : vector<14x1xf32> to vector<14x256xf32>
    %32 = arith.mulf %29, %31 : vector<14x256xf32>
    %33 = arith.addf %28, %32 : vector<14x256xf32>
    %c239_i32 = arith.constant 239 : i32
    %34 = tpu.dynamic_rotate %0 by %c239_i32 dim 1 : vector<14x256xf32>, i32 -> vector<14x256xf32>
    %35 = vector.extract_strided_slice %1 {offsets = [0, 6], sizes = [14, 1], strides = [1, 1]} : vector<14x25xf32> to vector<14x1xf32>
    %36 = vector.broadcast %35 : vector<14x1xf32> to vector<14x256xf32>
    %37 = arith.mulf %34, %36 : vector<14x256xf32>
    %38 = arith.addf %33, %37 : vector<14x256xf32>
    %c238_i32 = arith.constant 238 : i32
    %39 = tpu.dynamic_rotate %0 by %c238_i32 dim 1 : vector<14x256xf32>, i32 -> vector<14x256xf32>
    %40 = vector.extract_strided_slice %1 {offsets = [0, 7], sizes = [14, 1], strides = [1, 1]} : vector<14x25xf32> to vector<14x1xf32>
    %41 = vector.broadcast %40 : vector<14x1xf32> to vector<14x256xf32>
    %42 = arith.mulf %39, %41 : vector<14x256xf32>
    %43 = arith.addf %38, %42 : vector<14x256xf32>
    %c237_i32 = arith.constant 237 : i32
    %44 = tpu.dynamic_rotate %0 by %c237_i32 dim 1 : vector<14x256xf32>, i32 -> vector<14x256xf32>
    %45 = vector.extract_strided_slice %1 {offsets = [0, 8], sizes = [14, 1], strides = [1, 1]} : vector<14x25xf32> to vector<14x1xf32>
    %46 = vector.broadcast %45 : vector<14x1xf32> to vector<14x256xf32>
    %47 = arith.mulf %44, %46 : vector<14x256xf32>
    %48 = arith.addf %43, %47 : vector<14x256xf32>
    %c236_i32 = arith.constant 236 : i32
    %49 = tpu.dynamic_rotate %0 by %c236_i32 dim 1 : vector<14x256xf32>, i32 -> vector<14x256xf32>
    %50 = vector.extract_strided_slice %1 {offsets = [0, 9], sizes = [14, 1], strides = [1, 1]} : vector<14x25xf32> to vector<14x1xf32>
    %51 = vector.broadcast %50 : vector<14x1xf32> to vector<14x256xf32>
    %52 = arith.mulf %49, %51 : vector<14x256xf32>
    %53 = arith.addf %48, %52 : vector<14x256xf32>
    %c224_i32 = arith.constant 224 : i32
    %54 = tpu.dynamic_rotate %0 by %c224_i32 dim 1 : vector<14x256xf32>, i32 -> vector<14x256xf32>
    %55 = vector.extract_strided_slice %1 {offsets = [0, 10], sizes = [14, 1], strides = [1, 1]} : vector<14x25xf32> to vector<14x1xf32>
    %56 = vector.broadcast %55 : vector<14x1xf32> to vector<14x256xf32>
    %57 = arith.mulf %54, %56 : vector<14x256xf32>
    %58 = arith.addf %53, %57 : vector<14x256xf32>
    %c223_i32 = arith.constant 223 : i32
    %59 = tpu.dynamic_rotate %0 by %c223_i32 dim 1 : vector<14x256xf32>, i32 -> vector<14x256xf32>
    %60 = vector.extract_strided_slice %1 {offsets = [0, 11], sizes = [14, 1], strides = [1, 1]} : vector<14x25xf32> to vector<14x1xf32>
    %61 = vector.broadcast %60 : vector<14x1xf32> to vector<14x256xf32>
    %62 = arith.mulf %59, %61 : vector<14x256xf32>
    %63 = arith.addf %58, %62 : vector<14x256xf32>
    %c222_i32 = arith.constant 222 : i32
    %64 = tpu.dynamic_rotate %0 by %c222_i32 dim 1 : vector<14x256xf32>, i32 -> vector<14x256xf32>
    %65 = vector.extract_strided_slice %1 {offsets = [0, 12], sizes = [14, 1], strides = [1, 1]} : vector<14x25xf32> to vector<14x1xf32>
    %66 = vector.broadcast %65 : vector<14x1xf32> to vector<14x256xf32>
    %67 = arith.mulf %64, %66 : vector<14x256xf32>
    %68 = arith.addf %63, %67 : vector<14x256xf32>
    %c221_i32 = arith.constant 221 : i32
    %69 = tpu.dynamic_rotate %0 by %c221_i32 dim 1 : vector<14x256xf32>, i32 -> vector<14x256xf32>
    %70 = vector.extract_strided_slice %1 {offsets = [0, 13], sizes = [14, 1], strides = [1, 1]} : vector<14x25xf32> to vector<14x1xf32>
    %71 = vector.broadcast %70 : vector<14x1xf32> to vector<14x256xf32>
    %72 = arith.mulf %69, %71 : vector<14x256xf32>
    %73 = arith.addf %68, %72 : vector<14x256xf32>
    %c220_i32 = arith.constant 220 : i32
    %74 = tpu.dynamic_rotate %0 by %c220_i32 dim 1 : vector<14x256xf32>, i32 -> vector<14x256xf32>
    %75 = vector.extract_strided_slice %1 {offsets = [0, 14], sizes = [14, 1], strides = [1, 1]} : vector<14x25xf32> to vector<14x1xf32>
    %76 = vector.broadcast %75 : vector<14x1xf32> to vector<14x256xf32>
    %77 = arith.mulf %74, %76 : vector<14x256xf32>
    %78 = arith.addf %73, %77 : vector<14x256xf32>
    %c208_i32 = arith.constant 208 : i32
    %79 = tpu.dynamic_rotate %0 by %c208_i32 dim 1 : vector<14x256xf32>, i32 -> vector<14x256xf32>
    %80 = vector.extract_strided_slice %1 {offsets = [0, 15], sizes = [14, 1], strides = [1, 1]} : vector<14x25xf32> to vector<14x1xf32>
    %81 = vector.broadcast %80 : vector<14x1xf32> to vector<14x256xf32>
    %82 = arith.mulf %79, %81 : vector<14x256xf32>
    %83 = arith.addf %78, %82 : vector<14x256xf32>
    %c207_i32 = arith.constant 207 : i32
    %84 = tpu.dynamic_rotate %0 by %c207_i32 dim 1 : vector<14x256xf32>, i32 -> vector<14x256xf32>
    %85 = vector.extract_strided_slice %1 {offsets = [0, 16], sizes = [14, 1], strides = [1, 1]} : vector<14x25xf32> to vector<14x1xf32>
    %86 = vector.broadcast %85 : vector<14x1xf32> to vector<14x256xf32>
    %87 = arith.mulf %84, %86 : vector<14x256xf32>
    %88 = arith.addf %83, %87 : vector<14x256xf32>
    %c206_i32 = arith.constant 206 : i32
    %89 = tpu.dynamic_rotate %0 by %c206_i32 dim 1 : vector<14x256xf32>, i32 -> vector<14x256xf32>
    %90 = vector.extract_strided_slice %1 {offsets = [0, 17], sizes = [14, 1], strides = [1, 1]} : vector<14x25xf32> to vector<14x1xf32>
    %91 = vector.broadcast %90 : vector<14x1xf32> to vector<14x256xf32>
    %92 = arith.mulf %89, %91 : vector<14x256xf32>
    %93 = arith.addf %88, %92 : vector<14x256xf32>
    %c205_i32 = arith.constant 205 : i32
    %94 = tpu.dynamic_rotate %0 by %c205_i32 dim 1 : vector<14x256xf32>, i32 -> vector<14x256xf32>
    %95 = vector.extract_strided_slice %1 {offsets = [0, 18], sizes = [14, 1], strides = [1, 1]} : vector<14x25xf32> to vector<14x1xf32>
    %96 = vector.broadcast %95 : vector<14x1xf32> to vector<14x256xf32>
    %97 = arith.mulf %94, %96 : vector<14x256xf32>
    %98 = arith.addf %93, %97 : vector<14x256xf32>
    %c204_i32 = arith.constant 204 : i32
    %99 = tpu.dynamic_rotate %0 by %c204_i32 dim 1 : vector<14x256xf32>, i32 -> vector<14x256xf32>
    %100 = vector.extract_strided_slice %1 {offsets = [0, 19], sizes = [14, 1], strides = [1, 1]} : vector<14x25xf32> to vector<14x1xf32>
    %101 = vector.broadcast %100 : vector<14x1xf32> to vector<14x256xf32>
    %102 = arith.mulf %99, %101 : vector<14x256xf32>
    %103 = arith.addf %98, %102 : vector<14x256xf32>
    %c192_i32 = arith.constant 192 : i32
    %104 = tpu.dynamic_rotate %0 by %c192_i32 dim 1 : vector<14x256xf32>, i32 -> vector<14x256xf32>
    %105 = vector.extract_strided_slice %1 {offsets = [0, 20], sizes = [14, 1], strides = [1, 1]} : vector<14x25xf32> to vector<14x1xf32>
    %106 = vector.broadcast %105 : vector<14x1xf32> to vector<14x256xf32>
    %107 = arith.mulf %104, %106 : vector<14x256xf32>
    %108 = arith.addf %103, %107 : vector<14x256xf32>
    %c191_i32 = arith.constant 191 : i32
    %109 = tpu.dynamic_rotate %0 by %c191_i32 dim 1 : vector<14x256xf32>, i32 -> vector<14x256xf32>
    %110 = vector.extract_strided_slice %1 {offsets = [0, 21], sizes = [14, 1], strides = [1, 1]} : vector<14x25xf32> to vector<14x1xf32>
    %111 = vector.broadcast %110 : vector<14x1xf32> to vector<14x256xf32>
    %112 = arith.mulf %109, %111 : vector<14x256xf32>
    %113 = arith.addf %108, %112 : vector<14x256xf32>
    %c190_i32 = arith.constant 190 : i32
    %114 = tpu.dynamic_rotate %0 by %c190_i32 dim 1 : vector<14x256xf32>, i32 -> vector<14x256xf32>
    %115 = vector.extract_strided_slice %1 {offsets = [0, 22], sizes = [14, 1], strides = [1, 1]} : vector<14x25xf32> to vector<14x1xf32>
    %116 = vector.broadcast %115 : vector<14x1xf32> to vector<14x256xf32>
    %117 = arith.mulf %114, %116 : vector<14x256xf32>
    %118 = arith.addf %113, %117 : vector<14x256xf32>
    %c189_i32 = arith.constant 189 : i32
    %119 = tpu.dynamic_rotate %0 by %c189_i32 dim 1 : vector<14x256xf32>, i32 -> vector<14x256xf32>
    %120 = vector.extract_strided_slice %1 {offsets = [0, 23], sizes = [14, 1], strides = [1, 1]} : vector<14x25xf32> to vector<14x1xf32>
    %121 = vector.broadcast %120 : vector<14x1xf32> to vector<14x256xf32>
    %122 = arith.mulf %119, %121 : vector<14x256xf32>
    %123 = arith.addf %118, %122 : vector<14x256xf32>
    %c188_i32 = arith.constant 188 : i32
    %124 = tpu.dynamic_rotate %0 by %c188_i32 dim 1 : vector<14x256xf32>, i32 -> vector<14x256xf32>
    %125 = vector.extract_strided_slice %1 {offsets = [0, 24], sizes = [14, 1], strides = [1, 1]} : vector<14x25xf32> to vector<14x1xf32>
    %126 = vector.broadcast %125 : vector<14x1xf32> to vector<14x256xf32>
    %127 = arith.mulf %124, %126 : vector<14x256xf32>
    %128 = arith.addf %123, %127 : vector<14x256xf32>
    %c0_5 = arith.constant 0 : index
    %c0_6 = arith.constant 0 : index
    %129 = vector.load %arg4[%c0_5, %c0_6] : memref<14x256xf32, #tpu.memory_space<vmem>>, vector<14x256xf32>
    tpu.vector_store %arg4[%c0_5, %c0_6], %128 {strides = array<i32>} : memref<14x256xf32, #tpu.memory_space<vmem>>, vector<14x256xf32>,
    return
  }
  func.func @transform_0(%arg0: i32) -> (i32, i32) {
    %c0_i32 = arith.constant 0 : i32
    %c0_i32_0 = arith.constant 0 : i32
    return %arg0, %c0_i32 : i32, i32
  }
  func.func @transform_1(%arg0: i32) -> (i32, i32) {
    %c0_i32 = arith.constant 0 : i32
    %c0_i32_0 = arith.constant 0 : i32
    %c0_i32_1 = arith.constant 0 : i32
    return %c0_i32, %c0_i32_0 : i32, i32
  }
  func.func @transform_2(%arg0: i32) -> (i32, i32) {
    %c0_i32 = arith.constant 0 : i32
    %c0_i32_0 = arith.constant 0 : i32
    %c0_i32_1 = arith.constant 0 : i32
    return %c0_i32, %c0_i32_0 : i32, i32
  }
  func.func @transform_3(%arg0: i32) -> (i32, i32) {
    %c0_i32 = arith.constant 0 : i32
    %c0_i32_0 = arith.constant 0 : i32
    return %arg0, %c0_i32 : i32, i32
  }
}

</mosaic_0001>

<bundles_post_ra>
// kernel: tpu_custom_call.1
= control target key start
LH: loop header
LB: loop body
LE: loop exit
PB: predicated region body
PF: predicated region fallthrough
CT: control target
= control target key end

     0   :  { %8 = vsyncpa [#allocation3], 0  ;;  %s1482_s0 = inlined_call_operand.hbm [shape: f32[14,256], index: 0, kind: input, shape index: {}]   ;;  %s1483_s1 = inlined_call_operand.vmem [shape: f32[14,25], index: 1, kind: input, shape index: {}]   ;;  %s1484_s2 = inlined_call_operand.vmem [shape: f32[14,1], index: 2, kind: input, shape index: {}]   ;;  %s1485_s3 = inlined_call_operand.hbm [shape: f32[14,256], index: 3, kind: output, shape index: {}]  }
   0x1   :  { %9 = vsyncpa [#allocation4], 0  ;;  %s14_s14 = sshll.u32 %s1482_s0, 4  ;;  %s950_s15 = smov [#allocation2]   ;;  %s15_s14 = int_to_ptr.hbm [resolvable:$true] %s14_s14 }
   0x2   :  { %s16_s16 = sshll.u32 %s950_s15, 4  ;;  %s951_s17 = smov 256   ;;  %s17_s16 = int_to_ptr.vmem [resolvable:$true] %s16_s16 }
   0x3   :  { %s952_s18 = smov 16  }
   0x4   :  { %22 = dma.hbm_to_vmem [thread:$0]  %s15_s14, 512, %s17_s16, [#allocation3], %s951_s17, %s951_s17, %s952_s18  }
   0x5   :  { %946 = dma.done.wait [#allocation3], 512  }
   0x6   :  { %947 = vsyncadd [#allocation3], 4294966784  ;;  %v953_v0 = vmov 0   ;;  %v954_v1 = vmov 1   ;;  %v37_v2 = vld [vmem:[%s1484_s2] sm:$0xff]  ;;  %s955_s22 = smov 127   ;;  %v75_v21 = vlaneseq }
   0x7   :  { %842 = vset.pattern.permute.xlu1 %v953_v0  ;;  %841 = vset.pattern.permute.xlu0 %v953_v0  ;;  %v1035_v3 = vld [vmem:[%s1483_s1] sm:$0xff]  ;;  %v38_v5 = vld [vmem:[%s1484_s2 + $0x8] sm:$0x3f]  ;;  %v1049_v7 = vld [vmem:[#allocation2 + $0x10] sm:$0x3f]  ;;  %v956_v10 = vmov 2  }
   0x8   :  { %843 = vset.pattern.permute.xlu2 %v954_v1  ;;  %41 = vperm.xlu0 %841, %v37_v2   ;;  %v1038_v4 = vld [vmem:[#allocation2] sm:$0xff]  ;;  %v1047_v6 = vld [vmem:[%s1483_s1 + $0x8] sm:$0x3f]  ;;  %v1053_v8 = vld [vmem:[#allocation2 + $0x18] sm:$0x3f]  ;;  %s957_s2 = smov 126  }
   0x9   :  { %51 = vperm.xlu1 %842, %v1035_v3   ;;  %67 = vrot.lane.b32.xlu2 %v1038_v4, %s955_s22  ;;  %v1055_v9 = vld [vmem:[#allocation2 + $0x8] sm:$0xff]  ;;  %v958_v11 = vmov 3   ;;  %s959_s27 = smov 125   ;;  %s960_s28 = smov 124   ;;  %v961_v12 = vmov 4   ;;  %v963_v13 = vmov 5  }
   0xa   :  { %s962_s29 = smov 112   ;;  %s964_s30 = smov 111   ;;  %v965_v15 = vmov 6   ;;  %v967_v18 = vmov 7   ;;  %v1098_v23 = vand.u32 127, %v75_v21  ;;  %v969_v35 = vmov 8  }
   0xb   :  { %s966_s4 = smov 110   ;;  %s968_s5 = smov 109   ;;  %v971_v58 = vmov 9  }
   0xc   :  { %vm106_vm0 = vcmp.lt.s32.totalorder %v1098_v23, 126  ;;  %vm77_vm1 = vcmp.lt.s32.totalorder %v1098_v23, 127  ;;  %s970_s6 = smov 108   ;;  %vm135_vm2 = vcmp.lt.s32.totalorder %v1098_v23, 125  ;;  %s972_s7 = smov 96   ;;  %vm164_vm3 = vcmp.lt.s32.totalorder %v1098_v23, 124 }
   0xd   :  { %s974_s8 = smov 95   ;;  %s976_s9 = smov 94   ;;  %vm193_vm4 = vcmp.lt.s32.totalorder %v1098_v23, 112  ;;  %vm222_vm5 = vcmp.lt.s32.totalorder %v1098_v23, 111  ;;  %vm251_vm6 = vcmp.lt.s32.totalorder %v1098_v23, 110  ;;  %vm280_vm7 = vcmp.lt.s32.totalorder %v1098_v23, 109 }
   0xe   :  { %s978_s10 = smov 93   ;;  %s980_s11 = smov 92   ;;  %vm309_vm8 = vcmp.lt.s32.totalorder %v1098_v23, 108  ;;  %vm338_vm9 = vcmp.lt.s32.totalorder %v1098_v23, 96  ;;  %vm367_vm10 = vcmp.lt.s32.totalorder %v1098_v23, 95  ;;  %vm396_vm11 = vcmp.lt.s32.totalorder %v1098_v23, 94 }
   0xf   :  { %s982_s12 = smov 80   ;;  %s984_s13 = smov 79   ;;  %vm425_vm12 = vcmp.lt.s32.totalorder %v1098_v23, 93  ;;  %vm454_vm13 = vcmp.lt.s32.totalorder %v1098_v23, 92  ;;  %vm483_vm14 = vcmp.lt.s32.totalorder %v1098_v23, 80  ;;  %vm512_vm15 = vcmp.lt.s32.totalorder %v1098_v23, 79 }
  0x10   :  { %46 = vperm.xlu0 %841, %v38_v5   ;;  %s986_s14 = smov 78   ;;  %s988_s15 = smov 77  }
  0x11   :  { %56 = vperm.xlu1 %842, %v1047_v6   ;;  %69 = vrot.lane.b32.xlu2 %v1049_v7, %s955_s22  ;;  %s990_s16 = smov 76   ;;  %s992_s19 = smov 64  }
  0x12   :  { %s994_s20 = smov 63   ;;  %s996_s0 = smov 62  }
  0x13   :  { %s998_s21 = smov 61   ;;  %s1001_s26 = smov 60  }
  0x18   :  { %71 = vrot.lane.b32.xlu0 %v1055_v9, %s955_s22 }
  0x19   :  { %73 = vrot.lane.b32.xlu1 %v1053_v8, %s955_s22  ;;  %844 = vset.pattern.permute.xlu0 %v954_v1 }
  0x1a   :  { %846 = vset.pattern.permute.xlu1 %v956_v10  ;;  %83 = vperm.xlu2 %843, %v1035_v3  }
  0x20   :  { %87 = vperm.xlu0 %844, %v1047_v6  }
  0x21   :  { %98 = vrot.lane.b32.xlu1 %v1038_v4, %s957_s2 }
  0x22   :  { %100 = vrot.lane.b32.xlu2 %v1049_v7, %s957_s2 }
  0x23   :  { %848 = vset.pattern.permute.xlu2 %v958_v11 }
  0x28   :  { %845 = vset.pattern.permute.xlu0 %v956_v10 }
  0x29   :  { %102 = vrot.lane.b32.xlu1 %v1055_v9, %s957_s2  ;;  %112 = vperm.xlu0 %845, %v1035_v3  }
  0x2a   :  { %104 = vrot.lane.b32.xlu2 %v1053_v8, %s957_s2 }
  0x31   :  { %116 = vperm.xlu1 %846, %v1047_v6   ;;  %133 = vrot.lane.b32.xlu0 %v1053_v8, %s959_s27 }
  0x32   :  { %127 = vrot.lane.b32.xlu2 %v1038_v4, %s959_s27 }
  0x39   :  { %129 = vrot.lane.b32.xlu1 %v1049_v7, %s959_s27  ;;  %156 = vrot.lane.b32.xlu0 %v1038_v4, %s960_s28 }
  0x3a   :  { %847 = vset.pattern.permute.xlu1 %v958_v11  ;;  %131 = vrot.lane.b32.xlu2 %v1055_v9, %s959_s27 }
  0x41   :  { %141 = vperm.xlu1 %847, %v1035_v3   ;;  %162 = vrot.lane.b32.xlu0 %v1053_v8, %s960_s28 }
  0x42   :  { %145 = vperm.xlu2 %848, %v1047_v6  }
  0x49   :  { %158 = vrot.lane.b32.xlu1 %v1049_v7, %s960_s28  ;;  %185 = vrot.lane.b32.xlu0 %v1038_v4, %s962_s29 }
  0x4a   :  { %849 = vset.pattern.permute.xlu1 %v961_v12  ;;  %160 = vrot.lane.b32.xlu2 %v1055_v9, %s960_s28 }
  0x4b   :  { %850 = vset.pattern.permute.xlu2 %v961_v12 }
  0x51   :  { %170 = vperm.xlu1 %849, %v1035_v3   ;;  %191 = vrot.lane.b32.xlu0 %v1053_v8, %s962_s29 }
  0x52   :  { %174 = vperm.xlu2 %850, %v1047_v6  }
  0x59   :  { %187 = vrot.lane.b32.xlu1 %v1049_v7, %s962_s29  ;;  %214 = vrot.lane.b32.xlu0 %v1038_v4, %s964_s30 }
  0x5a   :  { %851 = vset.pattern.permute.xlu1 %v963_v13  ;;  %189 = vrot.lane.b32.xlu2 %v1055_v9, %s962_s29  ;;  %s775_s29 = sshll.u32 %s1485_s3, 4  ;;  %s776_s29 = int_to_ptr.hbm [resolvable:$true] %s775_s29 }
  0x5b   :  { %852 = vset.pattern.permute.xlu2 %v963_v13 }
  0x61   :  { %199 = vperm.xlu1 %851, %v1035_v3   ;;  %220 = vrot.lane.b32.xlu0 %v1053_v8, %s964_s30 }
  0x62   :  { %203 = vperm.xlu2 %852, %v1047_v6  }
  0x63   :  { %v68_v14 = vpop.permute.xlu2 %67 }
  0x69   :  { %216 = vrot.lane.b32.xlu1 %v1049_v7, %s964_s30  ;;  %243 = vrot.lane.b32.xlu0 %v1038_v4, %s966_s4 }
  0x6a   :  { %853 = vset.pattern.permute.xlu1 %v965_v15  ;;  %218 = vrot.lane.b32.xlu2 %v1055_v9, %s964_s30 }
  0x6b   :  { %854 = vset.pattern.permute.xlu2 %v965_v15  ;;  %v70_v16 = vpop.permute.xlu2 %69 }
  0x71   :  { %228 = vperm.xlu1 %853, %v1035_v3   ;;  %249 = vrot.lane.b32.xlu0 %v1053_v8, %s966_s4 }
  0x72   :  { %232 = vperm.xlu2 %854, %v1047_v6  }
  0x74   :  { %v84_v17 = vpop.permute.xlu2 %83 }
  0x79   :  { %245 = vrot.lane.b32.xlu1 %v1049_v7, %s966_s4  ;;  %272 = vrot.lane.b32.xlu0 %v1038_v4, %s968_s5 }
  0x7a   :  { %855 = vset.pattern.permute.xlu1 %v967_v18  ;;  %v42_v19 = vpop.permute.xlu0 %41  ;;  %247 = vrot.lane.b32.xlu2 %v1055_v9, %s966_s4 }
  0x7b   :  { %v52_v20 = vpop.permute.xlu1 %51  ;;  %856 = vset.pattern.permute.xlu2 %v967_v18 }
  0x7c   :  { %v101_v22 = vpop.permute.xlu2 %100  ;;  %v59_v33 = vmul.f32 %v52_v20, %v1038_v4  ;;  %v60_v34 = vmul.f32 %v52_v20, %v1055_v9 }
  0x7e   :  { %v63_v42 = vadd.f32 %v59_v33, %v42_v19  ;;  %v64_v43 = vadd.f32 %v60_v34, %v42_v19 }
  0x81   :  { %257 = vperm.xlu1 %855, %v1035_v3   ;;  %278 = vrot.lane.b32.xlu0 %v1053_v8, %s968_s5 }
  0x82   :  { %v47_v24 = vpop.permute.xlu0 %46  ;;  %261 = vperm.xlu2 %856, %v1047_v6  }
  0x83   :  { %v57_v25 = vpop.permute.xlu1 %56 }
  0x84   :  { %v61_v26 = vmul.f32 %v57_v25, %v1049_v7  ;;  %v62_v27 = vmul.f32 %v57_v25, %v1053_v8  ;;  %v105_v28 = vpop.permute.xlu2 %104 }
  0x85   :  { %v108_v31 = vsel %vm106_vm0, %v101_v22, %v105_v28  ;;  %v110_v32 = vsel %vm106_vm0, %v105_v28, %v101_v22 }
  0x86   :  { %v65_v29 = vadd.f32 %v61_v26, %v47_v24  ;;  %v66_v30 = vadd.f32 %v62_v27, %v47_v24 }
  0x89   :  { %274 = vrot.lane.b32.xlu1 %v1049_v7, %s968_s5  ;;  %301 = vrot.lane.b32.xlu0 %v1038_v4, %s970_s6 }
  0x8a   :  { %857 = vset.pattern.permute.xlu1 %v969_v35  ;;  %v72_v37 = vpop.permute.xlu0 %71  ;;  %276 = vrot.lane.b32.xlu2 %v1055_v9, %s968_s5 }
  0x8b   :  { %v74_v36 = vpop.permute.xlu1 %73  ;;  %v78_v40 = vsel %vm77_vm1, %v68_v14, %v72_v37  ;;  %v80_v41 = vsel %vm77_vm1, %v72_v37, %v68_v14  ;;  %858 = vset.pattern.permute.xlu2 %v969_v35  ;;  %v975_v37 = vmov 11  }
  0x8c   :  { %v79_v38 = vsel %vm77_vm1, %v70_v16, %v74_v36  ;;  %v81_v39 = vsel %vm77_vm1, %v74_v36, %v70_v16  ;;  %v90_v44 = vmul.f32 %v84_v17, %v78_v40  ;;  %v91_v45 = vmul.f32 %v84_v17, %v80_v41  ;;  %v128_v46 = vpop.permute.xlu2 %127 }
  0x8d   :  { %v973_v17 = vmov 10   ;;  %vm570_vm1 = vcmp.lt.s32.totalorder %v1098_v23, 77 }
  0x8e   :  { %v94_v47 = vadd.f32 %v90_v44, %v63_v42  ;;  %v95_v48 = vadd.f32 %v91_v45, %v64_v43 }
  0x91   :  { %286 = vperm.xlu1 %857, %v1035_v3   ;;  %307 = vrot.lane.b32.xlu0 %v1053_v8, %s970_s6 }
  0x92   :  { %v88_v49 = vpop.permute.xlu0 %87  ;;  %290 = vperm.xlu2 %858, %v1047_v6  }
  0x93   :  { %v99_v50 = vpop.permute.xlu1 %98  ;;  %v92_v51 = vmul.f32 %v88_v49, %v79_v38  ;;  %v93_v52 = vmul.f32 %v88_v49, %v81_v39 }
  0x94   :  { %v132_v53 = vpop.permute.xlu2 %131 }
  0x95   :  { %v96_v54 = vadd.f32 %v92_v51, %v65_v29  ;;  %v97_v55 = vadd.f32 %v93_v52, %v66_v30  ;;  %v136_v56 = vsel %vm135_vm2, %v128_v46, %v132_v53  ;;  %v138_v57 = vsel %vm135_vm2, %v132_v53, %v128_v46 }
  0x99   :  { %303 = vrot.lane.b32.xlu1 %v1049_v7, %s970_s6  ;;  %330 = vrot.lane.b32.xlu0 %v1038_v4, %s972_s7 }
  0x9a   :  { %859 = vset.pattern.permute.xlu1 %v971_v58  ;;  %305 = vrot.lane.b32.xlu2 %v1055_v9, %s970_s6 }
  0x9b   :  { %v103_v59 = vpop.permute.xlu1 %102  ;;  %v113_v62 = vpop.permute.xlu0 %112  ;;  %860 = vset.pattern.permute.xlu2 %v971_v58 }
  0x9c   :  { %v107_v60 = vsel %vm106_vm0, %v99_v50, %v103_v59  ;;  %v109_v61 = vsel %vm106_vm0, %v103_v59, %v99_v50  ;;  %v146_v1 = vpop.permute.xlu2 %145  ;;  %vm541_vm0 = vcmp.lt.s32.totalorder %v1098_v23, 78 }
  0x9d   :  { %v119_v63 = vmul.f32 %v113_v62, %v107_v60  ;;  %v120_v0 = vmul.f32 %v113_v62, %v109_v61 }
  0x9f   :  { %v123_v2 = vadd.f32 %v119_v63, %v94_v47  ;;  %v124_v5 = vadd.f32 %v120_v0, %v95_v48 }
  0xa1   :  { %315 = vperm.xlu1 %859, %v1035_v3   ;;  %336 = vrot.lane.b32.xlu0 %v1053_v8, %s972_s7 }
  0xa2   :  { %319 = vperm.xlu2 %860, %v1047_v6  }
  0xa3   :  { %v117_v10 = vpop.permute.xlu1 %116  ;;  %v134_v13 = vpop.permute.xlu0 %133 }
  0xa4   :  { %v121_v11 = vmul.f32 %v117_v10, %v108_v31  ;;  %v122_v12 = vmul.f32 %v117_v10, %v110_v32  ;;  %v161_v14 = vpop.permute.xlu2 %160 }
  0xa6   :  { %v125_v15 = vadd.f32 %v121_v11, %v96_v54  ;;  %v126_v16 = vadd.f32 %v122_v12, %v97_v55 }
  0xa9   :  { %332 = vrot.lane.b32.xlu1 %v1049_v7, %s972_s7  ;;  %359 = vrot.lane.b32.xlu0 %v1038_v4, %s974_s8 }
  0xaa   :  { %861 = vset.pattern.permute.xlu1 %v973_v17  ;;  %334 = vrot.lane.b32.xlu2 %v1055_v9, %s972_s7 }
  0xab   :  { %v130_v18 = vpop.permute.xlu1 %129  ;;  %v157_v21 = vpop.permute.xlu0 %156  ;;  %862 = vset.pattern.permute.xlu2 %v973_v17  ;;  %v979_v17 = vmov 13  }
  0xac   :  { %v137_v19 = vsel %vm135_vm2, %v130_v18, %v134_v13  ;;  %v139_v20 = vsel %vm135_vm2, %v134_v13, %v130_v18  ;;  %v165_v25 = vsel %vm164_vm3, %v157_v21, %v161_v14  ;;  %v167_v26 = vsel %vm164_vm3, %v161_v14, %v157_v21  ;;  %v175_v27 = vpop.permute.xlu2 %174 }
  0xad   :  { %v150_v22 = vmul.f32 %v146_v1, %v137_v19  ;;  %v151_v24 = vmul.f32 %v146_v1, %v139_v20  ;;  %vm599_vm2 = vcmp.lt.s32.totalorder %v1098_v23, 76 }
  0xaf   :  { %v154_v28 = vadd.f32 %v150_v22, %v125_v15  ;;  %v155_v29 = vadd.f32 %v151_v24, %v126_v16 }
  0xb1   :  { %344 = vperm.xlu1 %861, %v1035_v3   ;;  %365 = vrot.lane.b32.xlu0 %v1053_v8, %s974_s8 }
  0xb2   :  { %348 = vperm.xlu2 %862, %v1047_v6  }
  0xb3   :  { %v142_v30 = vpop.permute.xlu1 %141  ;;  %v163_v33 = vpop.permute.xlu0 %162 }
  0xb4   :  { %v148_v31 = vmul.f32 %v142_v30, %v136_v56  ;;  %v149_v32 = vmul.f32 %v142_v30, %v138_v57  ;;  %v190_v34 = vpop.permute.xlu2 %189  ;;  %v977_v56 = vmov 12  }
  0xb6   :  { %v152_v35 = vadd.f32 %v148_v31, %v123_v2  ;;  %v153_v36 = vadd.f32 %v149_v32, %v124_v5 }
  0xb9   :  { %361 = vrot.lane.b32.xlu1 %v1049_v7, %s974_s8  ;;  %388 = vrot.lane.b32.xlu0 %v1038_v4, %s976_s9 }
  0xba   :  { %863 = vset.pattern.permute.xlu1 %v975_v37  ;;  %363 = vrot.lane.b32.xlu2 %v1055_v9, %s974_s8 }
  0xbb   :  { %v159_v38 = vpop.permute.xlu1 %158  ;;  %v186_v41 = vpop.permute.xlu0 %185  ;;  %864 = vset.pattern.permute.xlu2 %v975_v37  ;;  %v981_v37 = vmov 14  }
  0xbc   :  { %v166_v39 = vsel %vm164_vm3, %v159_v38, %v163_v33  ;;  %v168_v40 = vsel %vm164_vm3, %v163_v33, %v159_v38  ;;  %v194_v44 = vsel %vm193_vm4, %v186_v41, %v190_v34  ;;  %v196_v45 = vsel %vm193_vm4, %v190_v34, %v186_v41  ;;  %v204_v46 = vpop.permute.xlu2 %203 }
  0xbd   :  { %v179_v42 = vmul.f32 %v175_v27, %v166_v39  ;;  %v180_v43 = vmul.f32 %v175_v27, %v168_v40  ;;  %vm628_vm3 = vcmp.lt.s32.totalorder %v1098_v23, 64 }
  0xbf   :  { %v183_v47 = vadd.f32 %v179_v42, %v154_v28  ;;  %v184_v48 = vadd.f32 %v180_v43, %v155_v29 }
  0xc1   :  { %373 = vperm.xlu1 %863, %v1035_v3   ;;  %394 = vrot.lane.b32.xlu0 %v1053_v8, %s976_s9 }
  0xc2   :  { %377 = vperm.xlu2 %864, %v1047_v6  }
  0xc3   :  { %v171_v49 = vpop.permute.xlu1 %170  ;;  %v192_v52 = vpop.permute.xlu0 %191 }
  0xc4   :  { %v177_v50 = vmul.f32 %v171_v49, %v165_v25  ;;  %v178_v51 = vmul.f32 %v171_v49, %v167_v26  ;;  %v219_v53 = vpop.permute.xlu2 %218 }
  0xc6   :  { %v181_v54 = vadd.f32 %v177_v50, %v152_v35  ;;  %v182_v55 = vadd.f32 %v178_v51, %v153_v36 }
  0xc9   :  { %390 = vrot.lane.b32.xlu1 %v1049_v7, %s976_s9  ;;  %417 = vrot.lane.b32.xlu0 %v1038_v4, %s978_s10 }
  0xca   :  { %865 = vset.pattern.permute.xlu1 %v977_v56  ;;  %392 = vrot.lane.b32.xlu2 %v1055_v9, %s976_s9 }
  0xcb   :  { %v188_v57 = vpop.permute.xlu1 %187  ;;  %v215_v60 = vpop.permute.xlu0 %214  ;;  %866 = vset.pattern.permute.xlu2 %v977_v56  ;;  %v983_v56 = vmov 15  }
  0xcc   :  { %v195_v58 = vsel %vm193_vm4, %v188_v57, %v192_v52  ;;  %v197_v59 = vsel %vm193_vm4, %v192_v52, %v188_v57  ;;  %v223_v63 = vsel %vm222_vm5, %v215_v60, %v219_v53  ;;  %v225_v0 = vsel %vm222_vm5, %v219_v53, %v215_v60  ;;  %v233_v1 = vpop.permute.xlu2 %232 }
  0xcd   :  { %v208_v61 = vmul.f32 %v204_v46, %v195_v58  ;;  %v209_v62 = vmul.f32 %v204_v46, %v197_v59  ;;  %vm657_vm4 = vcmp.lt.s32.totalorder %v1098_v23, 63 }
  0xcf   :  { %v212_v2 = vadd.f32 %v208_v61, %v183_v47  ;;  %v213_v5 = vadd.f32 %v209_v62, %v184_v48 }
  0xd1   :  { %402 = vperm.xlu1 %865, %v1035_v3   ;;  %423 = vrot.lane.b32.xlu0 %v1053_v8, %s978_s10 }
  0xd2   :  { %406 = vperm.xlu2 %866, %v1047_v6  }
  0xd3   :  { %v200_v10 = vpop.permute.xlu1 %199  ;;  %v221_v13 = vpop.permute.xlu0 %220 }
  0xd4   :  { %v206_v11 = vmul.f32 %v200_v10, %v194_v44  ;;  %v207_v12 = vmul.f32 %v200_v10, %v196_v45  ;;  %v248_v14 = vpop.permute.xlu2 %247 }
  0xd6   :  { %v210_v15 = vadd.f32 %v206_v11, %v181_v54  ;;  %v211_v16 = vadd.f32 %v207_v12, %v182_v55 }
  0xd9   :  { %419 = vrot.lane.b32.xlu1 %v1049_v7, %s978_s10  ;;  %446 = vrot.lane.b32.xlu0 %v1038_v4, %s980_s11 }
  0xda   :  { %867 = vset.pattern.permute.xlu1 %v979_v17  ;;  %421 = vrot.lane.b32.xlu2 %v1055_v9, %s978_s10 }
  0xdb   :  { %v217_v18 = vpop.permute.xlu1 %216  ;;  %v244_v21 = vpop.permute.xlu0 %243  ;;  %868 = vset.pattern.permute.xlu2 %v979_v17  ;;  %v985_v17 = vmov 16  }
  0xdc   :  { %v224_v19 = vsel %vm222_vm5, %v217_v18, %v221_v13  ;;  %v226_v20 = vsel %vm222_vm5, %v221_v13, %v217_v18  ;;  %v252_v25 = vsel %vm251_vm6, %v244_v21, %v248_v14  ;;  %v254_v26 = vsel %vm251_vm6, %v248_v14, %v244_v21  ;;  %v262_v27 = vpop.permute.xlu2 %261 }
  0xdd   :  { %v237_v22 = vmul.f32 %v233_v1, %v224_v19  ;;  %v238_v24 = vmul.f32 %v233_v1, %v226_v20  ;;  %vm686_vm5 = vcmp.lt.s32.totalorder %v1098_v23, 62 }
  0xdf   :  { %v241_v28 = vadd.f32 %v237_v22, %v212_v2  ;;  %v242_v29 = vadd.f32 %v238_v24, %v213_v5 }
  0xe1   :  { %431 = vperm.xlu1 %867, %v1035_v3   ;;  %452 = vrot.lane.b32.xlu0 %v1053_v8, %s980_s11 }
  0xe2   :  { %435 = vperm.xlu2 %868, %v1047_v6  }
  0xe3   :  { %v229_v30 = vpop.permute.xlu1 %228  ;;  %v250_v33 = vpop.permute.xlu0 %249 }
  0xe4   :  { %v235_v31 = vmul.f32 %v229_v30, %v223_v63  ;;  %v236_v32 = vmul.f32 %v229_v30, %v225_v0  ;;  %v277_v34 = vpop.permute.xlu2 %276 }
  0xe6   :  { %v239_v35 = vadd.f32 %v235_v31, %v210_v15  ;;  %v240_v36 = vadd.f32 %v236_v32, %v211_v16 }
  0xe9   :  { %448 = vrot.lane.b32.xlu1 %v1049_v7, %s980_s11  ;;  %475 = vrot.lane.b32.xlu0 %v1038_v4, %s982_s12 }
  0xea   :  { %869 = vset.pattern.permute.xlu1 %v981_v37  ;;  %450 = vrot.lane.b32.xlu2 %v1055_v9, %s980_s11 }
  0xeb   :  { %v246_v38 = vpop.permute.xlu1 %245  ;;  %v273_v41 = vpop.permute.xlu0 %272  ;;  %870 = vset.pattern.permute.xlu2 %v981_v37  ;;  %v987_v37 = vmov 17  }
  0xec   :  { %v253_v39 = vsel %vm251_vm6, %v246_v38, %v250_v33  ;;  %v255_v40 = vsel %vm251_vm6, %v250_v33, %v246_v38  ;;  %v281_v44 = vsel %vm280_vm7, %v273_v41, %v277_v34  ;;  %v283_v45 = vsel %vm280_vm7, %v277_v34, %v273_v41  ;;  %v291_v46 = vpop.permute.xlu2 %290 }
  0xed   :  { %v266_v42 = vmul.f32 %v262_v27, %v253_v39  ;;  %v267_v43 = vmul.f32 %v262_v27, %v255_v40  ;;  %vm715_vm6 = vcmp.lt.s32.totalorder %v1098_v23, 61 }
  0xef   :  { %v270_v47 = vadd.f32 %v266_v42, %v241_v28  ;;  %v271_v48 = vadd.f32 %v267_v43, %v242_v29 }
  0xf1   :  { %460 = vperm.xlu1 %869, %v1035_v3   ;;  %481 = vrot.lane.b32.xlu0 %v1053_v8, %s982_s12 }
  0xf2   :  { %464 = vperm.xlu2 %870, %v1047_v6  }
  0xf3   :  { %v258_v49 = vpop.permute.xlu1 %257  ;;  %v279_v52 = vpop.permute.xlu0 %278 }
  0xf4   :  { %v264_v50 = vmul.f32 %v258_v49, %v252_v25  ;;  %v265_v51 = vmul.f32 %v258_v49, %v254_v26  ;;  %v306_v53 = vpop.permute.xlu2 %305 }
  0xf6   :  { %v268_v54 = vadd.f32 %v264_v50, %v239_v35  ;;  %v269_v55 = vadd.f32 %v265_v51, %v240_v36 }
  0xf9   :  { %477 = vrot.lane.b32.xlu1 %v1049_v7, %s982_s12  ;;  %504 = vrot.lane.b32.xlu0 %v1038_v4, %s984_s13 }
  0xfa   :  { %871 = vset.pattern.permute.xlu1 %v983_v56  ;;  %479 = vrot.lane.b32.xlu2 %v1055_v9, %s982_s12 }
  0xfb   :  { %v275_v57 = vpop.permute.xlu1 %274  ;;  %v302_v60 = vpop.permute.xlu0 %301  ;;  %872 = vset.pattern.permute.xlu2 %v983_v56  ;;  %v989_v56 = vmov 18  }
  0xfc   :  { %v282_v58 = vsel %vm280_vm7, %v275_v57, %v279_v52  ;;  %v284_v59 = vsel %vm280_vm7, %v279_v52, %v275_v57  ;;  %v310_v63 = vsel %vm309_vm8, %v302_v60, %v306_v53  ;;  %v312_v0 = vsel %vm309_vm8, %v306_v53, %v302_v60  ;;  %v320_v1 = vpop.permute.xlu2 %319 }
  0xfd   :  { %v295_v61 = vmul.f32 %v291_v46, %v282_v58  ;;  %v296_v62 = vmul.f32 %v291_v46, %v284_v59  ;;  %vm744_vm7 = vcmp.lt.s32.totalorder %v1098_v23, 60 }
  0xff   :  { %v299_v2 = vadd.f32 %v295_v61, %v270_v47  ;;  %v300_v5 = vadd.f32 %v296_v62, %v271_v48 }
 0x101   :  { %489 = vperm.xlu1 %871, %v1035_v3   ;;  %510 = vrot.lane.b32.xlu0 %v1053_v8, %s984_s13 }
 0x102   :  { %493 = vperm.xlu2 %872, %v1047_v6  }
 0x103   :  { %v287_v10 = vpop.permute.xlu1 %286  ;;  %v308_v13 = vpop.permute.xlu0 %307 }
 0x104   :  { %v293_v11 = vmul.f32 %v287_v10, %v281_v44  ;;  %v294_v12 = vmul.f32 %v287_v10, %v283_v45  ;;  %v335_v14 = vpop.permute.xlu2 %334 }
 0x106   :  { %v297_v15 = vadd.f32 %v293_v11, %v268_v54  ;;  %v298_v16 = vadd.f32 %v294_v12, %v269_v55 }
 0x109   :  { %506 = vrot.lane.b32.xlu1 %v1049_v7, %s984_s13  ;;  %533 = vrot.lane.b32.xlu0 %v1038_v4, %s986_s14 }
 0x10a   :  { %873 = vset.pattern.permute.xlu1 %v985_v17  ;;  %508 = vrot.lane.b32.xlu2 %v1055_v9, %s984_s13 }
 0x10b   :  { %v304_v18 = vpop.permute.xlu1 %303  ;;  %v331_v21 = vpop.permute.xlu0 %330  ;;  %874 = vset.pattern.permute.xlu2 %v985_v17  ;;  %v991_v17 = vmov 19  }
 0x10c   :  { %v311_v19 = vsel %vm309_vm8, %v304_v18, %v308_v13  ;;  %v313_v20 = vsel %vm309_vm8, %v308_v13, %v304_v18  ;;  %v339_v25 = vsel %vm338_vm9, %v331_v21, %v335_v14  ;;  %v341_v26 = vsel %vm338_vm9, %v335_v14, %v331_v21  ;;  %v349_v27 = vpop.permute.xlu2 %348 }
 0x10d   :  { %v324_v22 = vmul.f32 %v320_v1, %v311_v19  ;;  %v325_v24 = vmul.f32 %v320_v1, %v313_v20 }
 0x10f   :  { %v328_v28 = vadd.f32 %v324_v22, %v299_v2  ;;  %v329_v29 = vadd.f32 %v325_v24, %v300_v5 }
 0x111   :  { %518 = vperm.xlu1 %873, %v1035_v3   ;;  %539 = vrot.lane.b32.xlu0 %v1053_v8, %s986_s14 }
 0x112   :  { %522 = vperm.xlu2 %874, %v1047_v6  }
 0x113   :  { %v316_v30 = vpop.permute.xlu1 %315  ;;  %v337_v33 = vpop.permute.xlu0 %336 }
 0x114   :  { %v322_v31 = vmul.f32 %v316_v30, %v310_v63  ;;  %v323_v32 = vmul.f32 %v316_v30, %v312_v0  ;;  %v364_v34 = vpop.permute.xlu2 %363 }
 0x116   :  { %v326_v35 = vadd.f32 %v322_v31, %v297_v15  ;;  %v327_v36 = vadd.f32 %v323_v32, %v298_v16 }
 0x119   :  { %535 = vrot.lane.b32.xlu1 %v1049_v7, %s986_s14  ;;  %562 = vrot.lane.b32.xlu0 %v1038_v4, %s988_s15 }
 0x11a   :  { %875 = vset.pattern.permute.xlu1 %v987_v37  ;;  %537 = vrot.lane.b32.xlu2 %v1055_v9, %s986_s14 }
 0x11b   :  { %v333_v38 = vpop.permute.xlu1 %332  ;;  %v360_v41 = vpop.permute.xlu0 %359  ;;  %876 = vset.pattern.permute.xlu2 %v987_v37  ;;  %v993_v37 = vmov 20  }
 0x11c   :  { %v340_v39 = vsel %vm338_vm9, %v333_v38, %v337_v33  ;;  %v342_v40 = vsel %vm338_vm9, %v337_v33, %v333_v38  ;;  %v368_v44 = vsel %vm367_vm10, %v360_v41, %v364_v34  ;;  %v370_v45 = vsel %vm367_vm10, %v364_v34, %v360_v41  ;;  %v378_v46 = vpop.permute.xlu2 %377 }
 0x11d   :  { %v353_v42 = vmul.f32 %v349_v27, %v340_v39  ;;  %v354_v43 = vmul.f32 %v349_v27, %v342_v40 }
 0x11f   :  { %v357_v47 = vadd.f32 %v353_v42, %v328_v28  ;;  %v358_v48 = vadd.f32 %v354_v43, %v329_v29 }
 0x121   :  { %547 = vperm.xlu1 %875, %v1035_v3   ;;  %568 = vrot.lane.b32.xlu0 %v1053_v8, %s988_s15 }
 0x122   :  { %551 = vperm.xlu2 %876, %v1047_v6  }
 0x123   :  { %v345_v49 = vpop.permute.xlu1 %344  ;;  %v366_v52 = vpop.permute.xlu0 %365 }
 0x124   :  { %v351_v50 = vmul.f32 %v345_v49, %v339_v25  ;;  %v352_v51 = vmul.f32 %v345_v49, %v341_v26  ;;  %v393_v53 = vpop.permute.xlu2 %392 }
 0x126   :  { %v355_v54 = vadd.f32 %v351_v50, %v326_v35  ;;  %v356_v55 = vadd.f32 %v352_v51, %v327_v36 }
 0x129   :  { %564 = vrot.lane.b32.xlu1 %v1049_v7, %s988_s15  ;;  %591 = vrot.lane.b32.xlu0 %v1038_v4, %s990_s16 }
 0x12a   :  { %877 = vset.pattern.permute.xlu1 %v989_v56  ;;  %566 = vrot.lane.b32.xlu2 %v1055_v9, %s988_s15 }
 0x12b   :  { %v362_v57 = vpop.permute.xlu1 %361  ;;  %v389_v60 = vpop.permute.xlu0 %388  ;;  %878 = vset.pattern.permute.xlu2 %v989_v56  ;;  %v995_v56 = vmov 21  }
 0x12c   :  { %v369_v58 = vsel %vm367_vm10, %v362_v57, %v366_v52  ;;  %v371_v59 = vsel %vm367_vm10, %v366_v52, %v362_v57  ;;  %v397_v63 = vsel %vm396_vm11, %v389_v60, %v393_v53  ;;  %v399_v0 = vsel %vm396_vm11, %v393_v53, %v389_v60  ;;  %v407_v1 = vpop.permute.xlu2 %406 }
 0x12d   :  { %v382_v61 = vmul.f32 %v378_v46, %v369_v58  ;;  %v383_v62 = vmul.f32 %v378_v46, %v371_v59 }
 0x12f   :  { %v386_v2 = vadd.f32 %v382_v61, %v357_v47  ;;  %v387_v5 = vadd.f32 %v383_v62, %v358_v48 }
 0x131   :  { %576 = vperm.xlu1 %877, %v1035_v3   ;;  %597 = vrot.lane.b32.xlu0 %v1053_v8, %s990_s16 }
 0x132   :  { %580 = vperm.xlu2 %878, %v1047_v6  }
 0x133   :  { %v374_v10 = vpop.permute.xlu1 %373  ;;  %v395_v13 = vpop.permute.xlu0 %394 }
 0x134   :  { %v380_v11 = vmul.f32 %v374_v10, %v368_v44  ;;  %v381_v12 = vmul.f32 %v374_v10, %v370_v45  ;;  %v422_v14 = vpop.permute.xlu2 %421 }
 0x136   :  { %v384_v15 = vadd.f32 %v380_v11, %v355_v54  ;;  %v385_v16 = vadd.f32 %v381_v12, %v356_v55 }
 0x139   :  { %593 = vrot.lane.b32.xlu1 %v1049_v7, %s990_s16  ;;  %620 = vrot.lane.b32.xlu0 %v1038_v4, %s992_s19 }
 0x13a   :  { %879 = vset.pattern.permute.xlu1 %v991_v17  ;;  %595 = vrot.lane.b32.xlu2 %v1055_v9, %s990_s16 }
 0x13b   :  { %v391_v18 = vpop.permute.xlu1 %390  ;;  %v418_v21 = vpop.permute.xlu0 %417  ;;  %880 = vset.pattern.permute.xlu2 %v991_v17  ;;  %v997_v17 = vmov 22  }
 0x13c   :  { %v398_v19 = vsel %vm396_vm11, %v391_v18, %v395_v13  ;;  %v400_v20 = vsel %vm396_vm11, %v395_v13, %v391_v18  ;;  %v426_v25 = vsel %vm425_vm12, %v418_v21, %v422_v14  ;;  %v428_v26 = vsel %vm425_vm12, %v422_v14, %v418_v21  ;;  %v436_v27 = vpop.permute.xlu2 %435 }
 0x13d   :  { %v411_v22 = vmul.f32 %v407_v1, %v398_v19  ;;  %v412_v24 = vmul.f32 %v407_v1, %v400_v20 }
 0x13f   :  { %v415_v28 = vadd.f32 %v411_v22, %v386_v2  ;;  %v416_v29 = vadd.f32 %v412_v24, %v387_v5 }
 0x141   :  { %605 = vperm.xlu1 %879, %v1035_v3   ;;  %626 = vrot.lane.b32.xlu0 %v1053_v8, %s992_s19 }
 0x142   :  { %609 = vperm.xlu2 %880, %v1047_v6  }
 0x143   :  { %v403_v30 = vpop.permute.xlu1 %402  ;;  %v424_v33 = vpop.permute.xlu0 %423 }
 0x144   :  { %v409_v31 = vmul.f32 %v403_v30, %v397_v63  ;;  %v410_v32 = vmul.f32 %v403_v30, %v399_v0  ;;  %v451_v34 = vpop.permute.xlu2 %450 }
 0x146   :  { %v413_v35 = vadd.f32 %v409_v31, %v384_v15  ;;  %v414_v36 = vadd.f32 %v410_v32, %v385_v16 }
 0x149   :  { %622 = vrot.lane.b32.xlu1 %v1049_v7, %s992_s19  ;;  %649 = vrot.lane.b32.xlu0 %v1038_v4, %s994_s20 }
 0x14a   :  { %881 = vset.pattern.permute.xlu1 %v993_v37  ;;  %624 = vrot.lane.b32.xlu2 %v1055_v9, %s992_s19 }
 0x14b   :  { %v420_v38 = vpop.permute.xlu1 %419  ;;  %v447_v41 = vpop.permute.xlu0 %446  ;;  %882 = vset.pattern.permute.xlu2 %v993_v37  ;;  %v896_v37 = vld [vmem:[#allocation2] sm:$0xff] }
 0x14c   :  { %v427_v39 = vsel %vm425_vm12, %v420_v38, %v424_v33  ;;  %v429_v40 = vsel %vm425_vm12, %v424_v33, %v420_v38  ;;  %v455_v44 = vsel %vm454_vm13, %v447_v41, %v451_v34  ;;  %v457_v45 = vsel %vm454_vm13, %v451_v34, %v447_v41  ;;  %v465_v46 = vpop.permute.xlu2 %464 }
 0x14d   :  { %v440_v42 = vmul.f32 %v436_v27, %v427_v39  ;;  %v441_v43 = vmul.f32 %v436_v27, %v429_v40  ;;  %v897_v39 = vld [vmem:[#allocation2 + $0x8] sm:$0xff] }
 0x14f   :  { %v444_v47 = vadd.f32 %v440_v42, %v415_v28  ;;  %v445_v48 = vadd.f32 %v441_v43, %v416_v29  ;;  %v894_v28 = vld [vmem:[%s1483_s1 + $0x8] sm:$0x3f] }
 0x151   :  { %634 = vperm.xlu1 %881, %v1035_v3   ;;  %655 = vrot.lane.b32.xlu0 %v1053_v8, %s994_s20 }
 0x152   :  { %638 = vperm.xlu2 %882, %v1047_v6  }
 0x153   :  { %v432_v49 = vpop.permute.xlu1 %431  ;;  %v453_v52 = vpop.permute.xlu0 %452 }
 0x154   :  { %v438_v50 = vmul.f32 %v432_v49, %v426_v25  ;;  %v439_v51 = vmul.f32 %v432_v49, %v428_v26  ;;  %v480_v53 = vpop.permute.xlu2 %479  ;;  %v892_v25 = vld [vmem:[%s1483_s1] sm:$0xff]  ;;  %v893_v26 = vld [vmem:[#allocation2 + $0x18] sm:$0x3f]  ;;  %s1002_s1 = smov [#allocation5]  }
 0x155   :  { %s773_s2 = sshll.u32 %s1002_s1, 4  ;;  %s774_s2 = int_to_ptr.vmem [resolvable:$true] %s773_s2 }
 0x156   :  { %v442_v54 = vadd.f32 %v438_v50, %v413_v35  ;;  %v443_v55 = vadd.f32 %v439_v51, %v414_v36  ;;  %v895_v35 = vld [vmem:[#allocation2 + $0x10] sm:$0x3f]  ;;  %v1000_v36 = vmov 23  }
 0x159   :  { %651 = vrot.lane.b32.xlu1 %v1049_v7, %s994_s20  ;;  %678 = vrot.lane.b32.xlu0 %v1038_v4, %s996_s0 }
 0x15a   :  { %883 = vset.pattern.permute.xlu1 %v995_v56  ;;  %653 = vrot.lane.b32.xlu2 %v1055_v9, %s994_s20 }
 0x15b   :  { %v449_v57 = vpop.permute.xlu1 %448  ;;  %v476_v60 = vpop.permute.xlu0 %475  ;;  %884 = vset.pattern.permute.xlu2 %v995_v56 }
 0x15c   :  { %v456_v58 = vsel %vm454_vm13, %v449_v57, %v453_v52  ;;  %v458_v59 = vsel %vm454_vm13, %v453_v52, %v449_v57  ;;  %v484_v63 = vsel %vm483_vm14, %v476_v60, %v480_v53  ;;  %v486_v0 = vsel %vm483_vm14, %v480_v53, %v476_v60  ;;  %v494_v1 = vpop.permute.xlu2 %493 }
 0x15d   :  { %v469_v61 = vmul.f32 %v465_v46, %v456_v58  ;;  %v470_v62 = vmul.f32 %v465_v46, %v458_v59 }
 0x15f   :  { %v473_v2 = vadd.f32 %v469_v61, %v444_v47  ;;  %v474_v5 = vadd.f32 %v470_v62, %v445_v48 }
 0x161   :  { %663 = vperm.xlu1 %883, %v1035_v3   ;;  %684 = vrot.lane.b32.xlu0 %v1053_v8, %s996_s0 }
 0x162   :  { %667 = vperm.xlu2 %884, %v1047_v6  }
 0x163   :  { %v461_v10 = vpop.permute.xlu1 %460  ;;  %v482_v13 = vpop.permute.xlu0 %481 }
 0x164   :  { %v467_v11 = vmul.f32 %v461_v10, %v455_v44  ;;  %v468_v12 = vmul.f32 %v461_v10, %v457_v45  ;;  %v509_v14 = vpop.permute.xlu2 %508 }
 0x166   :  { %v471_v15 = vadd.f32 %v467_v11, %v442_v54  ;;  %v472_v16 = vadd.f32 %v468_v12, %v443_v55 }
 0x169   :  { %680 = vrot.lane.b32.xlu1 %v1049_v7, %s996_s0  ;;  %707 = vrot.lane.b32.xlu0 %v1038_v4, %s998_s21 }
 0x16a   :  { %885 = vset.pattern.permute.xlu1 %v997_v17  ;;  %682 = vrot.lane.b32.xlu2 %v1055_v9, %s996_s0  ;;  %v999_v9 = vmov 24  }
 0x16b   :  { %v478_v3 = vpop.permute.xlu1 %477  ;;  %v505_v18 = vpop.permute.xlu0 %504  ;;  %886 = vset.pattern.permute.xlu2 %v997_v17  ;;  %891 = vset.pattern.permute.xlu0 %v999_v9 }
 0x16c   :  { %v485_v6 = vsel %vm483_vm14, %v478_v3, %v482_v13  ;;  %v487_v8 = vsel %vm483_vm14, %v482_v13, %v478_v3  ;;  %v513_v20 = vsel %vm512_vm15, %v505_v18, %v509_v14  ;;  %v515_v4 = vsel %vm512_vm15, %v509_v14, %v505_v18  ;;  %v523_v21 = vpop.permute.xlu2 %522 }
 0x16d   :  { %v498_v7 = vmul.f32 %v494_v1, %v485_v6  ;;  %v499_v19 = vmul.f32 %v494_v1, %v487_v8 }
 0x16f   :  { %v502_v22 = vadd.f32 %v498_v7, %v473_v2  ;;  %v503_v24 = vadd.f32 %v499_v19, %v474_v5 }
 0x171   :  { %692 = vperm.xlu1 %885, %v892_v25   ;;  %713 = vrot.lane.b32.xlu0 %v893_v26, %s998_s21 }
 0x172   :  { %696 = vperm.xlu2 %886, %v894_v28  }
 0x173   :  { %v490_v27 = vpop.permute.xlu1 %489  ;;  %v511_v31 = vpop.permute.xlu0 %510 }
 0x174   :  { %v496_v29 = vmul.f32 %v490_v27, %v484_v63  ;;  %v497_v30 = vmul.f32 %v490_v27, %v486_v0  ;;  %v538_v32 = vpop.permute.xlu2 %537 }
 0x176   :  { %v500_v33 = vadd.f32 %v496_v29, %v471_v15  ;;  %v501_v34 = vadd.f32 %v497_v30, %v472_v16 }
 0x179   :  { %709 = vrot.lane.b32.xlu1 %v895_v35, %s998_s21  ;;  %736 = vrot.lane.b32.xlu0 %v896_v37, %s1001_s26 }
 0x17a   :  { %887 = vset.pattern.permute.xlu1 %v1000_v36  ;;  %711 = vrot.lane.b32.xlu2 %v897_v39, %s998_s21 }
 0x17b   :  { %v507_v38 = vpop.permute.xlu1 %506  ;;  %v534_v42 = vpop.permute.xlu0 %533  ;;  %888 = vset.pattern.permute.xlu2 %v1000_v36 }
 0x17c   :  { %v514_v40 = vsel %vm512_vm15, %v507_v38, %v511_v31  ;;  %v516_v41 = vsel %vm512_vm15, %v511_v31, %v507_v38  ;;  %v542_v45 = vsel %vm541_vm0, %v534_v42, %v538_v32  ;;  %v544_v46 = vsel %vm541_vm0, %v538_v32, %v534_v42  ;;  %v552_v47 = vpop.permute.xlu2 %551 }
 0x17d   :  { %v527_v43 = vmul.f32 %v523_v21, %v514_v40  ;;  %v528_v44 = vmul.f32 %v523_v21, %v516_v41 }
 0x17f   :  { %v531_v48 = vadd.f32 %v527_v43, %v502_v22  ;;  %v532_v49 = vadd.f32 %v528_v44, %v503_v24 }
 0x181   :  { %721 = vperm.xlu1 %887, %v892_v25   ;;  %742 = vrot.lane.b32.xlu0 %v893_v26, %s1001_s26 }
 0x182   :  { %725 = vperm.xlu2 %888, %v894_v28  }
 0x183   :  { %v519_v50 = vpop.permute.xlu1 %518  ;;  %v540_v53 = vpop.permute.xlu0 %539 }
 0x184   :  { %v525_v51 = vmul.f32 %v519_v50, %v513_v20  ;;  %v526_v52 = vmul.f32 %v519_v50, %v515_v4  ;;  %v567_v54 = vpop.permute.xlu2 %566 }
 0x186   :  { %v529_v55 = vadd.f32 %v525_v51, %v500_v33  ;;  %v530_v56 = vadd.f32 %v526_v52, %v501_v34 }
 0x189   :  { %738 = vrot.lane.b32.xlu1 %v895_v35, %s1001_s26 }
 0x18a   :  { %889 = vset.pattern.permute.xlu1 %v999_v9  ;;  %740 = vrot.lane.b32.xlu2 %v897_v39, %s1001_s26 }
 0x18b   :  { %v536_v57 = vpop.permute.xlu1 %535  ;;  %v563_v60 = vpop.permute.xlu0 %562  ;;  %890 = vset.pattern.permute.xlu2 %v999_v9 }
 0x18c   :  { %v543_v58 = vsel %vm541_vm0, %v536_v57, %v540_v53  ;;  %v545_v59 = vsel %vm541_vm0, %v540_v53, %v536_v57  ;;  %v571_v63 = vsel %vm570_vm1, %v563_v60, %v567_v54  ;;  %v573_v0 = vsel %vm570_vm1, %v567_v54, %v563_v60  ;;  %v581_v1 = vpop.permute.xlu2 %580 }
 0x18d   :  { %v556_v61 = vmul.f32 %v552_v47, %v543_v58  ;;  %v557_v62 = vmul.f32 %v552_v47, %v545_v59 }
 0x18f   :  { %v560_v2 = vadd.f32 %v556_v61, %v531_v48  ;;  %v561_v5 = vadd.f32 %v557_v62, %v532_v49 }
 0x191   :  { %750 = vperm.xlu1 %889, %v892_v25  }
 0x192   :  { %754 = vperm.xlu2 %890, %v894_v28  }
 0x193   :  { %v548_v10 = vpop.permute.xlu1 %547  ;;  %v569_v13 = vpop.permute.xlu0 %568 }
 0x194   :  { %v554_v11 = vmul.f32 %v548_v10, %v542_v45  ;;  %v555_v12 = vmul.f32 %v548_v10, %v544_v46  ;;  %v596_v14 = vpop.permute.xlu2 %595 }
 0x196   :  { %v558_v15 = vadd.f32 %v554_v11, %v529_v55  ;;  %v559_v16 = vadd.f32 %v555_v12, %v530_v56 }
 0x19b   :  { %v565_v17 = vpop.permute.xlu1 %564  ;;  %v592_v8 = vpop.permute.xlu0 %591 }
 0x19c   :  { %v572_v3 = vsel %vm570_vm1, %v565_v17, %v569_v13  ;;  %v574_v6 = vsel %vm570_vm1, %v569_v13, %v565_v17  ;;  %v600_v19 = vsel %vm599_vm2, %v592_v8, %v596_v14  ;;  %v602_v20 = vsel %vm599_vm2, %v596_v14, %v592_v8  ;;  %v610_v4 = vpop.permute.xlu2 %609 }
 0x19d   :  { %v585_v18 = vmul.f32 %v581_v1, %v572_v3  ;;  %v586_v7 = vmul.f32 %v581_v1, %v574_v6 }
 0x19f   :  { %v589_v21 = vadd.f32 %v585_v18, %v560_v2  ;;  %v590_v22 = vadd.f32 %v586_v7, %v561_v5 }
 0x1a3   :  { %v577_v24 = vpop.permute.xlu1 %576  ;;  %v598_v26 = vpop.permute.xlu0 %597 }
 0x1a4   :  { %v583_v9 = vmul.f32 %v577_v24, %v571_v63  ;;  %v584_v25 = vmul.f32 %v577_v24, %v573_v0  ;;  %v625_v27 = vpop.permute.xlu2 %624 }
 0x1a6   :  { %v587_v28 = vadd.f32 %v583_v9, %v558_v15  ;;  %v588_v29 = vadd.f32 %v584_v25, %v559_v16 }
 0x1ab   :  { %v594_v30 = vpop.permute.xlu1 %593  ;;  %v621_v33 = vpop.permute.xlu0 %620 }
 0x1ac   :  { %v601_v31 = vsel %vm599_vm2, %v594_v30, %v598_v26  ;;  %v603_v32 = vsel %vm599_vm2, %v598_v26, %v594_v30  ;;  %v629_v36 = vsel %vm628_vm3, %v621_v33, %v625_v27  ;;  %v631_v37 = vsel %vm628_vm3, %v625_v27, %v621_v33  ;;  %v639_v38 = vpop.permute.xlu2 %638 }
 0x1ad   :  { %v614_v34 = vmul.f32 %v610_v4, %v601_v31  ;;  %v615_v35 = vmul.f32 %v610_v4, %v603_v32 }
 0x1af   :  { %v618_v39 = vadd.f32 %v614_v34, %v589_v21  ;;  %v619_v40 = vadd.f32 %v615_v35, %v590_v22 }
 0x1b3   :  { %v606_v41 = vpop.permute.xlu1 %605  ;;  %v627_v44 = vpop.permute.xlu0 %626 }
 0x1b4   :  { %v612_v42 = vmul.f32 %v606_v41, %v600_v19  ;;  %v613_v43 = vmul.f32 %v606_v41, %v602_v20  ;;  %v654_v45 = vpop.permute.xlu2 %653 }
 0x1b6   :  { %v616_v46 = vadd.f32 %v612_v42, %v587_v28  ;;  %v617_v47 = vadd.f32 %v613_v43, %v588_v29 }
 0x1bb   :  { %v623_v48 = vpop.permute.xlu1 %622  ;;  %v650_v49 = vpop.permute.xlu0 %649 }
 0x1bc   :  { %v668_v50 = vpop.permute.xlu2 %667  ;;  %v630_v12 = vsel %vm628_vm3, %v623_v48, %v627_v44  ;;  %v632_v14 = vsel %vm628_vm3, %v627_v44, %v623_v48  ;;  %v658_v31 = vsel %vm657_vm4, %v650_v49, %v654_v45  ;;  %v660_v32 = vsel %vm657_vm4, %v654_v45, %v650_v49 }
 0x1bd   :  { %v643_v17 = vmul.f32 %v639_v38, %v630_v12  ;;  %v644_v6 = vmul.f32 %v639_v38, %v632_v14 }
 0x1bf   :  { %v647_v4 = vadd.f32 %v643_v17, %v618_v39  ;;  %v648_v24 = vadd.f32 %v644_v6, %v619_v40 }
 0x1c3   :  { %v635_v51 = vpop.permute.xlu1 %634  ;;  %v656_v54 = vpop.permute.xlu0 %655 }
 0x1c4   :  { %v641_v52 = vmul.f32 %v635_v51, %v629_v36  ;;  %v642_v53 = vmul.f32 %v635_v51, %v631_v37  ;;  %v683_v57 = vpop.permute.xlu2 %682 }
 0x1c6   :  { %v1430_v55 = vadd.f32 %v641_v52, %v616_v46  ;;  %v1432_v56 = vadd.f32 %v642_v53, %v617_v47 }
 0x1cb   :  { %v652_v58 = vpop.permute.xlu1 %651  ;;  %v679_v59 = vpop.permute.xlu0 %678 }
 0x1cc   :  { %v697_v60 = vpop.permute.xlu2 %696  ;;  %v659_v16 = vsel %vm657_vm4, %v652_v58, %v656_v54  ;;  %v661_v3 = vsel %vm657_vm4, %v656_v54, %v652_v58  ;;  %v687_v34 = vsel %vm686_vm5, %v679_v59, %v683_v57  ;;  %v689_v35 = vsel %vm686_vm5, %v683_v57, %v679_v59 }
 0x1cd   :  { %v672_v18 = vmul.f32 %v668_v50, %v659_v16  ;;  %v673_v20 = vmul.f32 %v668_v50, %v661_v3 }
 0x1cf   :  { %v676_v26 = vadd.f32 %v672_v18, %v647_v4  ;;  %v677_v27 = vadd.f32 %v673_v20, %v648_v24 }
 0x1d3   :  { %v664_v61 = vpop.permute.xlu1 %663  ;;  %v685_v62 = vpop.permute.xlu0 %684 }
 0x1d4   :  { %v712_v1 = vpop.permute.xlu2 %711  ;;  %v670_v39 = vmul.f32 %v664_v61, %v658_v31  ;;  %v671_v40 = vmul.f32 %v664_v61, %v660_v32 }
 0x1d6   :  { %v674_v53 = vadd.f32 %v670_v39, %v1430_v55  ;;  %v675_v54 = vadd.f32 %v671_v40, %v1432_v56 }
 0x1db   :  { %v681_v63 = vpop.permute.xlu1 %680  ;;  %v708_v0 = vpop.permute.xlu0 %707 }
 0x1dc   :  { %v726_v10 = vpop.permute.xlu2 %725  ;;  %v688_v7 = vsel %vm686_vm5, %v681_v63, %v685_v62  ;;  %v690_v19 = vsel %vm686_vm5, %v685_v62, %v681_v63  ;;  %v716_v49 = vsel %vm715_vm6, %v708_v0, %v712_v1  ;;  %v718_v50 = vsel %vm715_vm6, %v712_v1, %v708_v0 }
 0x1dd   :  { %v701_v9 = vmul.f32 %v697_v60, %v688_v7  ;;  %v702_v25 = vmul.f32 %v697_v60, %v690_v19 }
 0x1df   :  { %v705_v36 = vadd.f32 %v701_v9, %v676_v26  ;;  %v706_v37 = vadd.f32 %v702_v25, %v677_v27 }
 0x1e3   :  { %v693_v2 = vpop.permute.xlu1 %692  ;;  %v714_v5 = vpop.permute.xlu0 %713 }
 0x1e4   :  { %v741_v15 = vpop.permute.xlu2 %740  ;;  %v699_v47 = vmul.f32 %v693_v2, %v687_v34  ;;  %v700_v48 = vmul.f32 %v693_v2, %v689_v35 }
 0x1e6   :  { %v703_v59 = vadd.f32 %v699_v47, %v674_v53  ;;  %v704_v60 = vadd.f32 %v700_v48, %v675_v54 }
 0x1eb   :  { %v710_v11 = vpop.permute.xlu1 %709  ;;  %v737_v13 = vpop.permute.xlu0 %736 }
 0x1ec   :  { %v717_v21 = vsel %vm715_vm6, %v710_v11, %v714_v5  ;;  %v719_v22 = vsel %vm715_vm6, %v714_v5, %v710_v11  ;;  %v755_v33 = vpop.permute.xlu2 %754  ;;  %v745_v62 = vsel %vm744_vm7, %v737_v13, %v741_v15  ;;  %v747_v63 = vsel %vm744_vm7, %v741_v15, %v737_v13 }
 0x1ed   :  { %v730_v28 = vmul.f32 %v726_v10, %v717_v21  ;;  %v731_v29 = vmul.f32 %v726_v10, %v719_v22 }
 0x1ef   :  { %v734_v43 = vadd.f32 %v730_v28, %v705_v36  ;;  %v735_v44 = vadd.f32 %v731_v29, %v706_v37 }
 0x1f3   :  { %v722_v8 = vpop.permute.xlu1 %721  ;;  %v743_v30 = vpop.permute.xlu0 %742 }
 0x1f4   :  { %v728_v57 = vmul.f32 %v722_v8, %v716_v49  ;;  %v729_v58 = vmul.f32 %v722_v8, %v718_v50 }
 0x1f6   :  { %v732_v0 = vadd.f32 %v728_v57, %v703_v59  ;;  %v733_v1 = vadd.f32 %v729_v58, %v704_v60 }
 0x1fb   :  { %v739_v38 = vpop.permute.xlu1 %738 }
 0x1fc   :  { %v746_v41 = vsel %vm744_vm7, %v739_v38, %v743_v30  ;;  %v748_v42 = vsel %vm744_vm7, %v743_v30, %v739_v38 }
 0x1fd   :  { %v759_v45 = vmul.f32 %v755_v33, %v746_v41  ;;  %v760_v46 = vmul.f32 %v755_v33, %v748_v42 }
 0x1ff   :  { %v763_v51 = vadd.f32 %v759_v45, %v734_v43  ;;  %v764_v52 = vadd.f32 %v760_v46, %v735_v44 }
 0x201   :  { %767 = vst [vmem:[#allocation5 + $0x10] sm:$0x3f] %v763_v51 }
 0x202   :  { %768 = vst [vmem:[#allocation5 + $0x18] sm:$0x3f] %v764_v52 }
 0x203   :  { %v751_v61 = vpop.permute.xlu1 %750 }
 0x204   :  { %v757_v2 = vmul.f32 %v751_v61, %v745_v62  ;;  %v758_v5 = vmul.f32 %v751_v61, %v747_v63 }
 0x206   :  { %v761_v55 = vadd.f32 %v757_v2, %v732_v0  ;;  %v762_v56 = vadd.f32 %v758_v5, %v733_v1 }
 0x208   :  { %765 = vst [vmem:[#allocation5] sm:$0xff] %v761_v55 }
 0x209   :  { %766 = vst [vmem:[#allocation5 + $0x8] sm:$0xff] %v762_v56 }
 0x20a   :  { %781 = dma.vmem_to_hbm [thread:$0]  %s774_s2, 512, %s776_s29, [#allocation4], %s951_s17, %s951_s17, %s952_s18  }
 0x20b   :  { %948 = dma.done.wait [#allocation4], 512  }
 0x20c   :  { %949 = vsyncadd [#allocation4], 4294966784 }
 0x20d   :  { %786 = vsyncpa [#allocation3], 1 }
 0x20e   :  { %787 = vsyncpa [#allocation4], 1 }

</bundles_post_ra>
